<compile_context>
chip_gen: v7x
topology: tpu7x:2x2x1
jax: 0.10.0
libtpu: 0.0.40
codegen_flags: <defaults>
</compile_context>

<pallas_src>
import jax
import jax.numpy as jnp
from jax.experimental import pallas as pl
from jax.experimental.pallas import tpu as pltpu


# ----------------------------------------------------------------------------
# ConvTranspose2d(k=4, s=2, p=1) tap tables.
# For output parity r=(ry,rx) and tap t=(dy,dx):
#   padded-input offset (oy,ox) = (_OFF[ry][dy], _OFF[rx][dx])    in {0,1,2}
#   kernel index        (ky,kx) = (_KIDX[ry][dy], _KIDX[rx][dx])
# The 16 (parity, tap) combos only touch the 9 distinct (oy,ox) shifts.
# ----------------------------------------------------------------------------
_OFF = ((1, 0), (2, 1))
_KIDX = ((1, 3), (0, 2))


def _tap_tables():
    shifts, kidxs = [], []
    for r in range(4):
        ry, rx = divmod(r, 2)
        srow, krow = [], []
        for t in range(4):
            dy, dx = divmod(t, 2)
            srow.append(_OFF[ry][dy] * 3 + _OFF[rx][dx])
            krow.append((_KIDX[ry][dy], _KIDX[rx][dx]))
        shifts.append(tuple(srow))
        kidxs.append(tuple(krow))
    return tuple(shifts), tuple(kidxs)


_PARITY_TAP_SHIFT, _PARITY_TAP_KIDX = _tap_tables()


# ----------------------------------------------------------------------------
# Kernel bodies
# ----------------------------------------------------------------------------
def _kernel_wide(p_ref, w_ref, sc_ref, sh_ref, o_ref):
    # p_ref : (tm, 9*Cin)   deduped im2col patches (ReLU already applied)
    # w_ref : (9*Cin, Np)   fused weight (4/9 dense), lane dim padded to 128k
    # sc_ref: (1, Np)       BN scale (f32 epilogue)
    # sh_ref: (1, Np)       folded conv-bias + BN shift (f32)
    # o_ref : (tm, Np)
    y = jnp.dot(p_ref[...], w_ref[...], preferred_element_type=jnp.float32)
    o_ref[...] = (y * sc_ref[...] + sh_ref[...]).astype(o_ref.dtype)


def _kernel_taps(p_ref, w_ref, sc_ref, sh_ref, o_ref):
    # Per-(parity, tap) dense dots: 100% useful MACs. Used for Cout >= 128.
    # p_ref : (tm, 9*Cin)
    # w_ref : (16, Cin, Cout) dense weight slabs, index = parity*4 + tap
    # sc_ref/sh_ref : (1, 4*Cout)
    # o_ref : (tm, 4*Cout)
    _, cin, cout = w_ref.shape
    for r in range(4):                      # static unroll over parities
        acc = None
        for t in range(4):                  # static unroll over taps
            s = _PARITY_TAP_SHIFT[r][t]
            part = jnp.dot(p_ref[:, s * cin:(s + 1) * cin], w_ref[4 * r + t],
                           preferred_element_type=jnp.float32)
            acc = part if acc is None else acc + part
        sc = sc_ref[:, r * cout:(r + 1) * cout]
        sh = sh_ref[:, r * cout:(r + 1) * cout]
        o_ref[:, r * cout:(r + 1) * cout] = (acc * sc + sh).astype(o_ref.dtype)


# ----------------------------------------------------------------------------
# VMEM-budgeted tiling helpers
# ----------------------------------------------------------------------------
def _vmem_budget():
    try:
        cap = int(pltpu.get_tpu_info().vmem_capacity_bytes)
    except Exception:
        cap = 64 * 1024 * 1024              # conservative default (v7x per-TC)
    limit = min(int(cap * 0.75), 100 * 1024 * 1024)
    return limit, int(limit * 0.8)


def _select_tm(m_total, per_row_bytes, fixed_bytes, budget):
    # Candidates: divisors of m_total, multiples of 8, fitting the VMEM budget
    # with double-buffered row tiles. Prefer >=4 (then >=2) grid steps so the
    # pipeline has work to overlap and v7x megacore can shard the axis.
    cands = [c for c in range(8, min(m_total, 2048) + 1, 8)
             if m_total % c == 0 and fixed_bytes + 2 * c * per_row_bytes <= budget]
    if not cands:
        # Weight alone exceeds the budget (very large Cin*Cout).
        # TODO(synk): add a K-split grid axis + VMEM f32 accumulator so the
        # weight streams in K-tiles when 9*Cin is very large.
        return 8 if m_total % 8 == 0 else m_total
    for min_tiles in (4, 2, 1):
        ok = [c for c in cands if m_total // c >= min_tiles]
        if ok:
            return ok[-1]
    return cands[-1]


# ----------------------------------------------------------------------------
# Wrapper
# ----------------------------------------------------------------------------
def unet_up_block(x_nchw, w_pt, conv_bias, gamma, beta, run_mean, run_var,
                  eps=1e-5, tm=None, compute_dtype=None, force_taps=None):
    """Fused ReLU -> ConvTranspose2d(4,2,1,bias) -> BatchNorm2d (eval) forward.

    Arguments mirror the PyTorch module parameters/buffers. Returns NCHW f32
    (B, Cout, 2H, 2W), matching the torch module output.
    """
    B, Cin, H, W = x_nchw.shape
    Cout = w_pt.shape[1]
    K9 = 9 * Cin
    Nout = 4 * Cout
    M = B * H * W

    if compute_dtype is None:
        # bf16 operands only where the MXU contraction depth pays for it.
        compute_dtype = jnp.bfloat16 if Cin >= 32 else jnp.float32
    dsize = jnp.dtype(compute_dtype).itemsize

    use_taps = (Cout >= 128) if force_taps is None else bool(force_taps)

    # ---- ReLU once per element, then deduped 9-shift im2col ----------------
    # TODO(synk): for very large Cin/H/W, build the 9 shifted views in-kernel
    # from a halo'd NHWC spatial tile (overlapping Element BlockSpec / manual
    # DMA) instead of materializing the 9x-inflated patch tensor in HBM.
    x_nhwc = jnp.transpose(x_nchw, (0, 2, 3, 1)).astype(jnp.float32)
    x_relu = jnp.maximum(x_nhwc, 0.0)       # Dropout2d == identity (eval mode)
    xp = jnp.pad(x_relu, ((0, 0), (1, 1), (1, 1), (0, 0)))
    shifts = [xp[:, oy:oy + H, ox:ox + W, :]
              for oy in range(3) for ox in range(3)]
    patches = jnp.concatenate(shifts, axis=-1).reshape(M, K9).astype(compute_dtype)

    # ---- BN affine as an f32 epilogue: y * scale + shift --------------------
    scale = (gamma / jnp.sqrt(run_var + eps)).astype(jnp.float32)         # (Cout,)
    shift = ((conv_bias - run_mean) * scale + beta).astype(jnp.float32)   # (Cout,)
    w_f32 = w_pt.astype(jnp.float32)                                      # (Cin,Cout,4,4)

    if use_taps:
        Np = Nout
        w_op = jnp.stack([w_f32[:, :, ky, kx]
                          for r in range(4) for (ky, kx) in _PARITY_TAP_KIDX[r]],
                         axis=0).astype(compute_dtype)                    # (16,Cin,Cout)
        weight_bytes = 16 * Cin * Cout * dsize
        kernel = _kernel_taps
        w_block = (16, Cin, Cout)
        w_index = lambda m: (0, 0, 0)
    else:
        Np = max(128, -(-Nout // 128) * 128)        # lane-dense output width
        wbd = jnp.zeros((K9, Np), jnp.float32)
        for r in range(4):
            for t in range(4):
                s = _PARITY_TAP_SHIFT[r][t]
                ky, kx = _PARITY_TAP_KIDX[r][t]
                wbd = wbd.at[s * Cin:(s + 1) * Cin,
                             r * Cout:(r + 1) * Cout].set(w_f32[:, :, ky, kx])
        w_op = wbd.astype(compute_dtype)
        weight_bytes = K9 * Np * dsize
        kernel = _kernel_wide
        w_block = (K9, Np)
        w_index = lambda m: (0, 0)

    sc_row = jnp.zeros((1, Np), jnp.float32).at[0, :Nout].set(jnp.tile(scale, 4))
    sh_row = jnp.zeros((1, Np), jnp.float32).at[0, :Nout].set(jnp.tile(shift, 4))

    # ---- generation-aware row tiling (no whole-patch re-pad) ---------------
    vmem_limit, budget = _vmem_budget()
    Mp = -(-M // 8) * 8
    if Mp != M:                              # rare (<8 tail rows)
        patches = jnp.pad(patches, ((0, Mp - M), (0, 0)))
    if tm is None:
        per_row = K9 * dsize + Np * 4        # double-buffered in + out rows
        fixed = 2 * weight_bytes + 4 * Np * 4  # conservative 2x weight + sc/sh
        tm = _select_tm(Mp, per_row, fixed, budget)
    grid = (Mp // tm,)

    cost = pl.CostEstimate(
        flops=2 * 16 * M * Cin * Cout,       # useful MACs only
        transcendentals=0,
        bytes_accessed=int(Mp * K9 * dsize + weight_bytes
                           + 2 * Np * 4 + Mp * Np * 4))

    def _invoke(single_buffer_invariants):
        inv = (dict(pipeline_mode=pl.Buffered(1))
               if single_buffer_invariants else {})
        return pl.pallas_call(
            kernel,
            out_shape=jax.ShapeDtypeStruct((Mp, Np), jnp.float32),
            grid=grid,
            in_specs=[
                pl.BlockSpec((tm, K9), lambda m: (m, 0)),
                pl.BlockSpec(w_block, w_index, **inv),      # grid-invariant
                pl.BlockSpec((1, Np), lambda m: (0, 0), **inv),
                pl.BlockSpec((1, Np), lambda m: (0, 0), **inv),
            ],
            out_specs=pl.BlockSpec((tm, Np), lambda m: (m, 0)),
            compiler_params=pltpu.CompilerParams(
                dimension_semantics=("parallel",),
                vmem_limit_bytes=vmem_limit),
            cost_estimate=cost,
        )(patches, w_op, sc_row, sh_row)

    try:
        out2d = _invoke(True)
    except Exception:        # jax version without single-buffer pipeline_mode
        out2d = _invoke(False)

    # ---- interleave the 4 parities back into the upsampled NCHW map --------
    # TODO(synk): downstream TPU layers generally prefer NHWC / parity-major
    # (M, 4*Cout); NCHW is kept here to match the torch module's output.
    out = out2d[:M, :Nout].reshape(B, H, W, 2, 2, Cout)
    out = out.transpose(0, 5, 1, 3, 2, 4).reshape(B, Cout, 2 * H, 2 * W)
    return out


# ----------------------------------------------------------------------------
# Pure-JAX reference (lax conv with input dilation == transposed conv), f32.
# ----------------------------------------------------------------------------
def _reference(x_nchw, w_pt, conv_bias, gamma, beta, run_mean, run_var, eps=1e-5):
    x = jnp.maximum(x_nchw.astype(jnp.float32), 0.0)
    x_nhwc = jnp.transpose(x, (0, 2, 3, 1))
    # ConvTranspose(k=4,s=2,p=1) == dilate-by-2 input, pad k-1-p=2, flipped kernel.
    w = jnp.flip(w_pt, axis=(2, 3)).transpose(2, 3, 0, 1)      # HWIO
    y = jax.lax.conv_general_dilated(
        x_nhwc, w, window_strides=(1, 1), padding=[(2, 2), (2, 2)],
        lhs_dilation=(2, 2), dimension_numbers=('NHWC', 'HWIO', 'NHWC'))
    y = y + conv_bias
    y = (y - run_mean) / jnp.sqrt(run_var + eps) * gamma + beta
    return jnp.transpose(y, (0, 3, 1, 2))


if __name__ == "__main__":
    # Innermost UNetUpBlock: input_nc=8 -> output_nc=16, kernel_size=4.
    B, Cin, H, W = 2, 8, 8, 8
    Cout = 16

    key = jax.random.PRNGKey(0)
    kx, kw, kb, kg, kbt, km, kv = jax.random.split(key, 7)

    x = jax.random.normal(kx, (B, Cin, H, W), dtype=jnp.float32)        # NCHW
    w_pt = 0.1 * jax.random.normal(kw, (Cin, Cout, 4, 4), jnp.float32)  # ConvT W
    conv_bias = 0.1 * jax.random.normal(kb, (Cout,), jnp.float32)
    gamma = 1.0 + 0.1 * jax.random.normal(kg, (Cout,), jnp.float32)     # BN weight
    beta = 0.1 * jax.random.normal(kbt, (Cout,), jnp.float32)           # BN bias
    run_mean = 0.1 * jax.random.normal(km, (Cout,), jnp.float32)
    run_var = 0.5 + jnp.abs(jax.random.normal(kv, (Cout,), jnp.float32))

    # TODO(synk): training-mode Dropout2d (RNG channel masks) and
    # batch-statistic BatchNorm are not reproduced (eval semantics only).

    ref = _reference(x, w_pt, conv_bias, gamma, beta, run_mean, run_var)

    # 1) Default path: wide fused matmul (lane-padded output), f32 operands.
    out = jax.block_until_ready(
        unet_up_block(x, w_pt, conv_bias, gamma, beta, run_mean, run_var))
    assert out.shape == (B, Cout, 2 * H, 2 * W), out.shape
    assert jnp.allclose(out, ref, atol=1e-4, rtol=1e-4), float(
        jnp.max(jnp.abs(out - ref)))

    # 2) Per-(parity,tap) dense-dot path (used automatically for Cout >= 128).
    out_t = jax.block_until_ready(
        unet_up_block(x, w_pt, conv_bias, gamma, beta, run_mean, run_var,
                      force_taps=True))
    assert jnp.allclose(out_t, ref, atol=1e-4, rtol=1e-4), float(
        jnp.max(jnp.abs(out_t - ref)))

    # 3) bf16-operand path (what real large-channel UNet blocks auto-select).
    out_b = jax.block_until_ready(
        unet_up_block(x, w_pt, conv_bias, gamma, beta, run_mean, run_var,
                      compute_dtype=jnp.bfloat16))
    assert jnp.allclose(out_b, ref, atol=3e-2, rtol=3e-2), float(
        jnp.max(jnp.abs(out_b - ref)))

    print("KERNEL_OK")
</pallas_src>

<mosaic_0001>
module attributes {stable_mosaic.version = 11 : i64} {
  func.func @_kernel_wide(%arg0: i32, %arg1: memref<32x72xf32, #tpu.memory_space<vmem>>, %arg2: memref<72x128xf32, #tpu.memory_space<vmem>>, %arg3: memref<1x128xf32, #tpu.memory_space<vmem>>, %arg4: memref<1x128xf32, #tpu.memory_space<vmem>>, %arg5: memref<32x128xf32, #tpu.memory_space<vmem>>) attributes {dimension_semantics = [#tpu.dimension_semantics<parallel>], iteration_bounds = array<i64: 4>, scalar_prefetch = 0 : i64, scratch_operands = 0 : i64, tpu.core_type = #tpu.core_type<tc>, window_params = [{transform_indices = @transform_0, window_bounds = array<i64: 32, 72>}, {pipeline_mode = #tpu.pipeline_mode<synchronous>, transform_indices = @transform_1, window_bounds = array<i64: 72, 128>}, {pipeline_mode = #tpu.pipeline_mode<synchronous>, transform_indices = @transform_2, window_bounds = array<i64: 1, 128>}, {pipeline_mode = #tpu.pipeline_mode<synchronous>, transform_indices = @transform_3, window_bounds = array<i64: 1, 128>}, {transform_indices = @transform_4, window_bounds = array<i64: 32, 128>}]} {
    %c0 = arith.constant 0 : index
    %c0_0 = arith.constant 0 : index
    %0 = vector.load %arg1[%c0, %c0_0] : memref<32x72xf32, #tpu.memory_space<vmem>>, vector<32x72xf32>
    %c0_1 = arith.constant 0 : index
    %c0_2 = arith.constant 0 : index
    %1 = vector.load %arg2[%c0_1, %c0_2] : memref<72x128xf32, #tpu.memory_space<vmem>>, vector<72x128xf32>
    %cst = arith.constant dense<0.000000e+00> : vector<32x128xf32>
    %2 = tpu.matmul %0, %1, %cst {dimension_numbers = #tpu.dot_dimension_numbers<[1], [0], [0], [1], [0, 0, 1, 1], [], []>} : vector<32x72xf32>, vector<72x128xf32>, vector<32x128xf32> -> vector<32x128xf32>
    %c0_3 = arith.constant 0 : index
    %c0_4 = arith.constant 0 : index
    %3 = vector.load %arg3[%c0_3, %c0_4] : memref<1x128xf32, #tpu.memory_space<vmem>>, vector<1x128xf32>
    %4 = vector.broadcast %3 : vector<1x128xf32> to vector<32x128xf32>
    %5 = arith.mulf %2, %4 : vector<32x128xf32>
    %c0_5 = arith.constant 0 : index
    %c0_6 = arith.constant 0 : index
    %6 = vector.load %arg4[%c0_5, %c0_6] : memref<1x128xf32, #tpu.memory_space<vmem>>, vector<1x128xf32>
    %7 = vector.broadcast %6 : vector<1x128xf32> to vector<32x128xf32>
    %8 = arith.addf %5, %7 : vector<32x128xf32>
    %c0_7 = arith.constant 0 : index
    %c0_8 = arith.constant 0 : index
    %9 = vector.load %arg5[%c0_7, %c0_8] : memref<32x128xf32, #tpu.memory_space<vmem>>, vector<32x128xf32>
    tpu.vector_store %arg5[%c0_7, %c0_8], %8 {strides = array<i32>} : memref<32x128xf32, #tpu.memory_space<vmem>>, vector<32x128xf32>,
    return
  }
  func.func @transform_0(%arg0: i32) -> (i32, i32) {
    %c0_i32 = arith.constant 0 : i32
    %c0_i32_0 = arith.constant 0 : i32
    return %arg0, %c0_i32 : i32, i32
  }
  func.func @transform_1(%arg0: i32) -> (i32, i32) {
    %c0_i32 = arith.constant 0 : i32
    %c0_i32_0 = arith.constant 0 : i32
    %c0_i32_1 = arith.constant 0 : i32
    return %c0_i32, %c0_i32_0 : i32, i32
  }
  func.func @transform_2(%arg0: i32) -> (i32, i32) {
    %c0_i32 = arith.constant 0 : i32
    %c0_i32_0 = arith.constant 0 : i32
    %c0_i32_1 = arith.constant 0 : i32
    return %c0_i32, %c0_i32_0 : i32, i32
  }
  func.func @transform_3(%arg0: i32) -> (i32, i32) {
    %c0_i32 = arith.constant 0 : i32
    %c0_i32_0 = arith.constant 0 : i32
    %c0_i32_1 = arith.constant 0 : i32
    return %c0_i32, %c0_i32_0 : i32, i32
  }
  func.func @transform_4(%arg0: i32) -> (i32, i32) {
    %c0_i32 = arith.constant 0 : i32
    %c0_i32_0 = arith.constant 0 : i32
    return %arg0, %c0_i32 : i32, i32
  }
}

module attributes {stable_mosaic.version = 11 : i64} {
  func.func @_kernel_wide(%arg0: i32, %arg1: memref<32x72xf32, #tpu.memory_space<vmem>>, %arg2: memref<72x128xf32, #tpu.memory_space<vmem>>, %arg3: memref<1x128xf32, #tpu.memory_space<vmem>>, %arg4: memref<1x128xf32, #tpu.memory_space<vmem>>, %arg5: memref<32x128xf32, #tpu.memory_space<vmem>>) attributes {dimension_semantics = [#tpu.dimension_semantics<parallel>], iteration_bounds = array<i64: 4>, scalar_prefetch = 0 : i64, scratch_operands = 0 : i64, tpu.core_type = #tpu.core_type<tc>, window_params = [{transform_indices = @transform_0, window_bounds = array<i64: 32, 72>}, {pipeline_mode = #tpu.pipeline_mode<synchronous>, transform_indices = @transform_1, window_bounds = array<i64: 72, 128>}, {pipeline_mode = #tpu.pipeline_mode<synchronous>, transform_indices = @transform_2, window_bounds = array<i64: 1, 128>}, {pipeline_mode = #tpu.pipeline_mode<synchronous>, transform_indices = @transform_3, window_bounds = array<i64: 1, 128>}, {transform_indices = @transform_4, window_bounds = array<i64: 32, 128>}]} {
    %c0 = arith.constant 0 : index
    %c0_0 = arith.constant 0 : index
    %0 = vector.load %arg1[%c0, %c0_0] : memref<32x72xf32, #tpu.memory_space<vmem>>, vector<32x72xf32>
    %c0_1 = arith.constant 0 : index
    %c0_2 = arith.constant 0 : index
    %1 = vector.load %arg2[%c0_1, %c0_2] : memref<72x128xf32, #tpu.memory_space<vmem>>, vector<72x128xf32>
    %cst = arith.constant dense<0.000000e+00> : vector<32x128xf32>
    %2 = tpu.matmul %0, %1, %cst {dimension_numbers = #tpu.dot_dimension_numbers<[1], [0], [0], [1], [0, 0, 1, 1], [], []>} : vector<32x72xf32>, vector<72x128xf32>, vector<32x128xf32> -> vector<32x128xf32>
    %c0_3 = arith.constant 0 : index
    %c0_4 = arith.constant 0 : index
    %3 = vector.load %arg3[%c0_3, %c0_4] : memref<1x128xf32, #tpu.memory_space<vmem>>, vector<1x128xf32>
    %4 = vector.broadcast %3 : vector<1x128xf32> to vector<32x128xf32>
    %5 = arith.mulf %2, %4 : vector<32x128xf32>
    %c0_5 = arith.constant 0 : index
    %c0_6 = arith.constant 0 : index
    %6 = vector.load %arg4[%c0_5, %c0_6] : memref<1x128xf32, #tpu.memory_space<vmem>>, vector<1x128xf32>
    %7 = vector.broadcast %6 : vector<1x128xf32> to vector<32x128xf32>
    %8 = arith.addf %5, %7 : vector<32x128xf32>
    %c0_7 = arith.constant 0 : index
    %c0_8 = arith.constant 0 : index
    %9 = vector.load %arg5[%c0_7, %c0_8] : memref<32x128xf32, #tpu.memory_space<vmem>>, vector<32x128xf32>
    tpu.vector_store %arg5[%c0_7, %c0_8], %8 {strides = array<i32>} : memref<32x128xf32, #tpu.memory_space<vmem>>, vector<32x128xf32>,
    return
  }
  func.func @transform_0(%arg0: i32) -> (i32, i32) {
    %c0_i32 = arith.constant 0 : i32
    %c0_i32_0 = arith.constant 0 : i32
    return %arg0, %c0_i32 : i32, i32
  }
  func.func @transform_1(%arg0: i32) -> (i32, i32) {
    %c0_i32 = arith.constant 0 : i32
    %c0_i32_0 = arith.constant 0 : i32
    %c0_i32_1 = arith.constant 0 : i32
    return %c0_i32, %c0_i32_0 : i32, i32
  }
  func.func @transform_2(%arg0: i32) -> (i32, i32) {
    %c0_i32 = arith.constant 0 : i32
    %c0_i32_0 = arith.constant 0 : i32
    %c0_i32_1 = arith.constant 0 : i32
    return %c0_i32, %c0_i32_0 : i32, i32
  }
  func.func @transform_3(%arg0: i32) -> (i32, i32) {
    %c0_i32 = arith.constant 0 : i32
    %c0_i32_0 = arith.constant 0 : i32
    %c0_i32_1 = arith.constant 0 : i32
    return %c0_i32, %c0_i32_0 : i32, i32
  }
  func.func @transform_4(%arg0: i32) -> (i32, i32) {
    %c0_i32 = arith.constant 0 : i32
    %c0_i32_0 = arith.constant 0 : i32
    return %arg0, %c0_i32 : i32, i32
  }
}

</mosaic_0001>

<bundles_post_ra>
// kernel: tpu_custom_call.1
= control target key start
LH: loop header
LB: loop body
LE: loop exit
PB: predicated region body
PF: predicated region fallthrough
CT: control target
= control target key end

     0   :  { %9 = vsyncpa [#allocation3], 0  ;;  %s766_s0 = inlined_call_operand.vmem [shape: f32[128,72], index: 0, kind: input, shape index: {}]   ;;  %s767_s1 = inlined_call_operand.vmem [shape: f32[72,128], index: 1, kind: input, shape index: {}]   ;;  %s768_s2 = inlined_call_operand.vmem [shape: f32[1,128], index: 2, kind: input, shape index: {}]   ;;  %s769_s3 = inlined_call_operand.vmem [shape: f32[1,128], index: 3, kind: input, shape index: {}]   ;;  %s770_s4 = inlined_call_operand.hbm [shape: f32[128,128], index: 4, kind: output, shape index: {}]  }
   0x1   :  { %11 = vsyncpa [#allocation3 + $0x1], 0  ;;  %s627_s15 = smov 0   ;;  %s629_s16 = smov 0  }
   0x2   :  { %s631_s17 = smov 0   ;;  %s633_s18 = smov 0  }
   0x3 LB: > { %s648_s19 = sadd.s32 4294967295, %s597_s18   ;;  %s412_s20 = sadd.s32 4294967294, %s597_s18   ;;  %s597_s18 = sphi %s633_s18, %s776_s18   ;;  %s593_s17 = sphi %s631_s17, %s775_s17   ;;  %s589_s16 = sphi %s629_s16, %s774_s16   ;;  %s585_s15 = sphi %s627_s15, %s773_s15  }
   0x4   : > { %s652_s21 = sadd.s32 1, %s597_s18   ;;  %s113_s22 = sadd.s32 1, %s593_s17 }
   0x5   : > { %s110_s23 = ssub.s32 %s597_s18, %s652_s21  ;;  %p123_p0 = scmp.ne.s32.totalorder %s593_s17, %s589_s16 }
   0x6   : > { %p111_p1 = scmp.eq.s32.totalorder %s110_s23, 0  ;;  %p124_p2 = scmp.eq.s32.totalorder %s648_s19, 3 }
   0x7   : > { %p129_p3 = scmp.ne.s32.totalorder %s589_s16, %s585_s15  ;;  %p130_p4 = scmp.eq.s32.totalorder %s412_s20, 3 }
   0x8   : > { %s663_s24 = scalar_select %p111_p1, %s593_s17, %s113_s22  }
   0x9   : > { %p665_p5 = por %p124_p2, %p123_p0  ;;  %p669_p6 = por %p130_p4, %p129_p3 }
   0xa   : > { %p415_p7 = scmp.ge.s32.totalorder %s597_s18, 1  ;;  %p166_p8 = scmp.lt.s32.totalorder %s597_s18, 5 }
   0xc   : > { %p167_p9 = pnand %p415_p7, %p166_p8 }
   0xd   : > { %v203_v0 = vld [vmem:[%s767_s1] sm:$0xff] (!%p167_p9)  ;;  %v204_v1 = vld [vmem:[%s767_s1 + $0x8] sm:$0xff] (!%p167_p9)  ;;  %v205_v2 = vld [vmem:[%s767_s1 + $0x10] sm:$0xff] (!%p167_p9)  ;;  %s417_s7 = sshll.u32 (!%p167_p9), %s648_s19, 2  ;;  %vm212_vm0 = vcmask (!%p167_p9), 588800   ;;  %s430_s20 = sshll.u32 (!%p167_p9), %s648_s19, 9 }
   0xe   : > { %170 = sbr.rel (%p167_p9) target bundleno = 267 (0x10b), region = 36  ;;  %v468_v3 = vpack.c.bf16 (!%p167_p9), %v204_v1, %v203_v0  ;;  %v206_v4 = vld [vmem:[%s767_s1 + $0x18] sm:$0xff] (!%p167_p9)  ;;  %p193_p10 = scmp.lt.s32.totalorder (!%p167_p9), %s417_s7, 15  ;;  %v207_v6 = vld [vmem:[%s767_s1 + $0x20] sm:$0xff] (!%p167_p9)  ;;  %v208_v7 = vld [vmem:[%s767_s1 + $0x28] sm:$0xff] (!%p167_p9) }
   0xf   : > { %v472_v5 = vpack.c.bf16 (!%p167_p9), %v206_v4, %v205_v2  ;;  %v476_v8 = vpack.c.bf16 (!%p167_p9), %v208_v7, %v207_v6  ;;  %v209_v9 = vld [vmem:[%s767_s1 + $0x30] sm:$0xff] (!%p167_p9)  ;;  %v210_v10 = vld [vmem:[%s767_s1 + $0x38] sm:$0xff] (!%p167_p9)  ;;  %v211_v14 = vld [vmem:[%s767_s1 + $0x40] sm:$0xff] (!%p167_p9)  ;;  %s723_s27 = scalar_lea.hbm (!%p167_p9), %s770_s4, %s430_s20  ;;  %s599_s29 = smov (!%p167_p9), [#allocation2]  }
  0x10   : > { %469 = vmatprep.subr.bf16.mxu0 (!%p167_p9), %v468_v3  ;;  %484 = vmatprep.subr.bf16.mxu1 (!%p167_p9), %v468_v3  ;;  %v480_v13 = vpack.c.bf16 (!%p167_p9), %v210_v10, %v209_v9  ;;  %v423_v17 = vld [vmem:[%s768_s2] ss:$0 sm:$0xff] (!%p167_p9) }
  0x11   : > { %471 = vmatpush3.bf16.msra.mxu0 (!%p167_p9), %v468_v3  ;;  %489 = vmatpush3.bf16.msra.mxu1 (!%p167_p9), %v468_v3  ;;  %v424_v19 = vld [vmem:[%s769_s3] ss:$0 sm:$0xff] (!%p167_p9) }
  0x12   : > { %473 = vmatprep.subr.bf16.mxu0 (!%p167_p9), %v472_v5  ;;  %485 = vmatprep.subr.bf16.mxu1 (!%p167_p9), %v472_v5 }
  0x15   : > { %s778_s7 = smov (!%p193_p10, %s417_s7), 15  ;;  %475 = vmatpush3.bf16.msra.mxu0 %v472_v5  ;;  %490 = vmatpush3.bf16.msra.mxu1 %v472_v5 }
  0x16   : > { %s418_s14 = sshll.u32 %s778_s7, 3  ;;  %477 = vmatprep.subr.bf16.mxu0 %v476_v8  ;;  %486 = vmatprep.subr.bf16.mxu1 %v476_v8  ;;  %s189_s7 = sand.u32 1, %s589_s16  }
  0x17   : > { %s196_s30 = scalar_lea.vmem %s766_s0, %s418_s14  ;;  %s416_s8 = sshll.u32 %s189_s7, 5 }
  0x18   : > { %v199_v11 = vld [vmem:[%s196_s30] sm:$0xff]  ;;  %v201_v12 = vld [vmem:[%s196_s30 + $0x10] sm:$0xff]  ;;  %v200_v15 = vld [vmem:[%s196_s30 + $0x8] sm:$0xff]  ;;  %s191_s13 = scalar_lea.vmem [#allocation2], %s416_s8  ;;  %s725_s19 = scalar_lea.sflag [#allocation3], %s189_s7 }
  0x19   : > { %462 = vmatprep.mubr.msk.f32.mxu0 %vm212_vm0, %v199_v11  ;;  %465 = vmatprep.mubr.msk.f32.mxu1 %vm212_vm0, %v201_v12  ;;  %v202_v16 = vld [vmem:[%s196_s30 + $0x18] sm:$0xff]  ;;  %s350_s14 = sshll.u32 %s191_s13, 4  ;;  %s539_s30 = sshll.u32 %s599_s29, 4  ;;  %s718_s14 = int_to_ptr.vmem [resolvable:$true] %s350_s14  ;;  %s540_s30 = int_to_ptr.vmem [resolvable:$false] %s539_s30 }
  0x1a   : > { %479 = vmatpush3.bf16.msra.mxu0 %v476_v8  ;;  %491 = vmatpush3.bf16.msra.mxu1 %v476_v8  ;;  %s535_s28 = scalar_lea.vmem %s718_s14, 512  ;;  %s541_s5 = scalar_lea.vmem %s540_s30, 1024 }
  0x1b   : > { %481 = vmatprep.subr.bf16.mxu0 %v480_v13  ;;  %487 = vmatprep.subr.bf16.mxu1 %v480_v13  ;;  %p536_p11 = scmp.ne.s32.totalorder %s718_s14, %s535_s28  ;;  %p542_p0 = scmp.lt.s32.totalorder %s718_s14, %s540_s30 }
  0x1c   : > { %p543_p1 = scmp.lt.s32.totalorder %s541_s5, %s535_s28 }
  0x1d   : > { %p537_p12 = pnand %p536_p11, %p665_p5 }
  0x1e   : > { %483 = vmatpush3.bf16.msra.mxu0 %v480_v13  ;;  %492 = vmatpush3.bf16.msra.mxu1 %v480_v13  ;;  %p544_p2 = por %p543_p1, %p542_p0 }
  0x1f   : > { %460 = vmatprep.subr.mxu0 %v211_v14  ;;  %488 = vmatprep.subr.mxu1 %v211_v14  ;;  %p538_p13 = pneg %p537_p12 }
  0x21   : > { %p545_p3 = pnand %p544_p2, %p538_p13 }
  0x22   : > { %461 = vmatpush3.msra.mxu0 %v211_v14  ;;  %493 = vmatpush3.msra.mxu1 %v211_v14 }
  0x23   : > { %463 = vmatmul.mubr.msk.f32.vlgmr.msra.gmra.mrb[0].mxu0 %vm212_vm0, %v200_v15  ;;  %466 = vmatmul.mubr.msk.f32.vlgmr.msra.gmra.mrb[0].mxu1 %vm212_vm0, %v202_v16 }
  0xf6   : > { %v464_v18 = vpop.f32.mrb[0].mxu0  ;;  %v467_v20 = vpop.f32.mrb[0].mxu1 }
  0xf7   : > { %v318_v21 = vmul.f32 %v464_v18, %v423_v17  ;;  %v320_v22 = vmul.f32 %v467_v20, %v423_v17  ;;  %v291_v23 = vpop.f32.mrb[1].mxu0  ;;  %v301_v24 = vpop.f32.mrb[1].mxu1 }
  0xf8   : > { %v317_v25 = vmul.f32 %v423_v17, %v291_v23  ;;  %v319_v26 = vmul.f32 %v423_v17, %v301_v24 }
  0xf9   : > { %v329_v27 = vadd.f32 %v424_v19, %v318_v21  ;;  %v331_v28 = vadd.f32 %v424_v19, %v320_v22 }
  0xfa   : > { %v328_v29 = vadd.f32 %v424_v19, %v317_v25  ;;  %v330_v30 = vadd.f32 %v424_v19, %v319_v26 }
  0xfb   : > { %333 = vst [vmem:[%s191_s13 + $0x8] sm:$0xff] %v329_v27  ;;  %335 = vst [vmem:[%s191_s13 + $0x18] sm:$0xff] %v331_v28 }
  0xfc   : > { %332 = vst [vmem:[%s191_s13] sm:$0xff] %v328_v29  ;;  %334 = vst [vmem:[%s191_s13 + $0x10] sm:$0xff] %v330_v30 }
  0xfd   : > { %548 = shalt.err (!%p545_p3)
}
  0xfe   : > { %s549_s6 = scalar_lea.hbm %s723_s27, 512  ;;  %s553_s9 = scalar_lea.hbm %s770_s4, 2048 }
  0xff   : > { %p550_p4 = scmp.ne.s32.totalorder %s723_s27, %s549_s6  ;;  %p554_p9 = scmp.lt.u32.totalorder %s723_s27, %s770_s4 }
 0x100   : > { %p555_p10 = scmp.lt.u32.totalorder %s553_s9, %s549_s6  ;;  %p557_p12 = scmp.lt.u32.totalorder %s549_s6, %s723_s27 }
 0x101   : > { %p551_p7 = pnand %p550_p4, %p665_p5 }
 0x102   : > { %p556_p11 = por %p555_p10, %p554_p9 }
 0x103   : > { %p552_p8 = pneg %p551_p7 }
 0x104   : > { %p558_p13 = por %p557_p12, %p556_p11 }
 0x106   : > { %p559_p0 = pnand %p558_p13, %p552_p8 }
 0x108   : > { %562 = shalt.err (!%p559_p0)
}
 0x109   : > { %s600_s12 = smov 128   ;;  %s601_s13 = smov 8  }
 0x10a   : > { %494 = dma.vmem_to_hbm [thread:$0]  (%p665_p5), %s718_s14, 512, %s723_s27, %s725_s19, %s600_s12, %s600_s12, %s601_s13  }
 0x10b PF: > { %p500_p1 = scmp.ge.s32.totalorder %s597_s18, 2  ;;  %s365_s20 = sand.u32 1, %s585_s15  }
 0x10c   : > { %s366_s22 = scalar_lea.sflag [#allocation3], %s365_s20 }
 0x10d   : > { %p497_p2 = pnand %p500_p1, %p669_p6 }
 0x10f   : > { %580 = dma.done.wait (!%p497_p2), %s366_s22, 512  }
 0x110   : > { %582 = vsyncadd (!%p497_p2), %s366_s22, 4294966784  ;;  %p14_p3 = scmp.ge.s32.totalorder %s652_s21, 6   ;;  %s773_s15 = smov %s589_s16 }
 0x111   : > { %s774_s16 = smov %s593_s17  ;;  %s775_s17 = smov %s663_s24 }
 0x112   : > { %s776_s18 = smov %s652_s21  ;;  %16 = sbr.rel (!%p14_p3) target bundleno = 3 (0x3), region = 71 }
 0x119   :  { %371 = vsyncpa [#allocation3], 1 }
 0x11a   :  { %373 = vsyncpa [#allocation3 + $0x1], 1 }

// kernel: tpu_custom_call.1
= control target key start
LH: loop header
LB: loop body
LE: loop exit
PB: predicated region body
PF: predicated region fallthrough
CT: control target
= control target key end

     0   :  { %9 = vsyncpa [#allocation3], 0  ;;  %s766_s0 = inlined_call_operand.vmem [shape: f32[128,72], index: 0, kind: input, shape index: {}]   ;;  %s767_s1 = inlined_call_operand.vmem [shape: f32[72,128], index: 1, kind: input, shape index: {}]   ;;  %s768_s2 = inlined_call_operand.vmem [shape: f32[1,128], index: 2, kind: input, shape index: {}]   ;;  %s769_s3 = inlined_call_operand.vmem [shape: f32[1,128], index: 3, kind: input, shape index: {}]   ;;  %s770_s4 = inlined_call_operand.hbm [shape: f32[128,128], index: 4, kind: output, shape index: {}]  }
   0x1   :  { %11 = vsyncpa [#allocation3 + $0x1], 0  ;;  %s627_s15 = smov 0   ;;  %s629_s16 = smov 0  }
   0x2   :  { %s631_s17 = smov 0   ;;  %s633_s18 = smov 0  }
   0x3 LB: > { %s648_s19 = sadd.s32 4294967295, %s597_s18   ;;  %s412_s20 = sadd.s32 4294967294, %s597_s18   ;;  %s597_s18 = sphi %s633_s18, %s776_s18   ;;  %s593_s17 = sphi %s631_s17, %s775_s17   ;;  %s589_s16 = sphi %s629_s16, %s774_s16   ;;  %s585_s15 = sphi %s627_s15, %s773_s15  }
   0x4   : > { %s652_s21 = sadd.s32 1, %s597_s18   ;;  %s113_s22 = sadd.s32 1, %s593_s17 }
   0x5   : > { %s110_s23 = ssub.s32 %s597_s18, %s652_s21  ;;  %p123_p0 = scmp.ne.s32.totalorder %s593_s17, %s589_s16 }
   0x6   : > { %p111_p1 = scmp.eq.s32.totalorder %s110_s23, 0  ;;  %p124_p2 = scmp.eq.s32.totalorder %s648_s19, 3 }
   0x7   : > { %p129_p3 = scmp.ne.s32.totalorder %s589_s16, %s585_s15  ;;  %p130_p4 = scmp.eq.s32.totalorder %s412_s20, 3 }
   0x8   : > { %s663_s24 = scalar_select %p111_p1, %s593_s17, %s113_s22  }
   0x9   : > { %p665_p5 = por %p124_p2, %p123_p0  ;;  %p669_p6 = por %p130_p4, %p129_p3 }
   0xa   : > { %p415_p7 = scmp.ge.s32.totalorder %s597_s18, 1  ;;  %p166_p8 = scmp.lt.s32.totalorder %s597_s18, 5 }
   0xc   : > { %p167_p9 = pnand %p415_p7, %p166_p8 }
   0xd   : > { %v203_v0 = vld [vmem:[%s767_s1] sm:$0xff] (!%p167_p9)  ;;  %v204_v1 = vld [vmem:[%s767_s1 + $0x8] sm:$0xff] (!%p167_p9)  ;;  %v205_v2 = vld [vmem:[%s767_s1 + $0x10] sm:$0xff] (!%p167_p9)  ;;  %s417_s7 = sshll.u32 (!%p167_p9), %s648_s19, 2  ;;  %vm212_vm0 = vcmask (!%p167_p9), 588800   ;;  %s430_s20 = sshll.u32 (!%p167_p9), %s648_s19, 9 }
   0xe   : > { %170 = sbr.rel (%p167_p9) target bundleno = 267 (0x10b), region = 36  ;;  %v468_v3 = vpack.c.bf16 (!%p167_p9), %v204_v1, %v203_v0  ;;  %v206_v4 = vld [vmem:[%s767_s1 + $0x18] sm:$0xff] (!%p167_p9)  ;;  %p193_p10 = scmp.lt.s32.totalorder (!%p167_p9), %s417_s7, 15  ;;  %v207_v6 = vld [vmem:[%s767_s1 + $0x20] sm:$0xff] (!%p167_p9)  ;;  %v208_v7 = vld [vmem:[%s767_s1 + $0x28] sm:$0xff] (!%p167_p9) }
   0xf   : > { %v472_v5 = vpack.c.bf16 (!%p167_p9), %v206_v4, %v205_v2  ;;  %v476_v8 = vpack.c.bf16 (!%p167_p9), %v208_v7, %v207_v6  ;;  %v209_v9 = vld [vmem:[%s767_s1 + $0x30] sm:$0xff] (!%p167_p9)  ;;  %v210_v10 = vld [vmem:[%s767_s1 + $0x38] sm:$0xff] (!%p167_p9)  ;;  %v211_v14 = vld [vmem:[%s767_s1 + $0x40] sm:$0xff] (!%p167_p9)  ;;  %s723_s27 = scalar_lea.hbm (!%p167_p9), %s770_s4, %s430_s20  ;;  %s599_s29 = smov (!%p167_p9), [#allocation2]  }
  0x10   : > { %469 = vmatprep.subr.bf16.mxu0 (!%p167_p9), %v468_v3  ;;  %484 = vmatprep.subr.bf16.mxu1 (!%p167_p9), %v468_v3  ;;  %v480_v13 = vpack.c.bf16 (!%p167_p9), %v210_v10, %v209_v9  ;;  %v423_v17 = vld [vmem:[%s768_s2] ss:$0 sm:$0xff] (!%p167_p9) }
  0x11   : > { %471 = vmatpush3.bf16.msra.mxu0 (!%p167_p9), %v468_v3  ;;  %489 = vmatpush3.bf16.msra.mxu1 (!%p167_p9), %v468_v3  ;;  %v424_v19 = vld [vmem:[%s769_s3] ss:$0 sm:$0xff] (!%p167_p9) }
  0x12   : > { %473 = vmatprep.subr.bf16.mxu0 (!%p167_p9), %v472_v5  ;;  %485 = vmatprep.subr.bf16.mxu1 (!%p167_p9), %v472_v5 }
  0x15   : > { %s778_s7 = smov (!%p193_p10, %s417_s7), 15  ;;  %475 = vmatpush3.bf16.msra.mxu0 %v472_v5  ;;  %490 = vmatpush3.bf16.msra.mxu1 %v472_v5 }
  0x16   : > { %s418_s14 = sshll.u32 %s778_s7, 3  ;;  %477 = vmatprep.subr.bf16.mxu0 %v476_v8  ;;  %486 = vmatprep.subr.bf16.mxu1 %v476_v8  ;;  %s189_s7 = sand.u32 1, %s589_s16  }
  0x17   : > { %s196_s30 = scalar_lea.vmem %s766_s0, %s418_s14  ;;  %s416_s8 = sshll.u32 %s189_s7, 5 }
  0x18   : > { %v199_v11 = vld [vmem:[%s196_s30] sm:$0xff]  ;;  %v201_v12 = vld [vmem:[%s196_s30 + $0x10] sm:$0xff]  ;;  %v200_v15 = vld [vmem:[%s196_s30 + $0x8] sm:$0xff]  ;;  %s191_s13 = scalar_lea.vmem [#allocation2], %s416_s8  ;;  %s725_s19 = scalar_lea.sflag [#allocation3], %s189_s7 }
  0x19   : > { %462 = vmatprep.mubr.msk.f32.mxu0 %vm212_vm0, %v199_v11  ;;  %465 = vmatprep.mubr.msk.f32.mxu1 %vm212_vm0, %v201_v12  ;;  %v202_v16 = vld [vmem:[%s196_s30 + $0x18] sm:$0xff]  ;;  %s350_s14 = sshll.u32 %s191_s13, 4  ;;  %s539_s30 = sshll.u32 %s599_s29, 4  ;;  %s718_s14 = int_to_ptr.vmem [resolvable:$true] %s350_s14  ;;  %s540_s30 = int_to_ptr.vmem [resolvable:$false] %s539_s30 }
  0x1a   : > { %479 = vmatpush3.bf16.msra.mxu0 %v476_v8  ;;  %491 = vmatpush3.bf16.msra.mxu1 %v476_v8  ;;  %s535_s28 = scalar_lea.vmem %s718_s14, 512  ;;  %s541_s5 = scalar_lea.vmem %s540_s30, 1024 }
  0x1b   : > { %481 = vmatprep.subr.bf16.mxu0 %v480_v13  ;;  %487 = vmatprep.subr.bf16.mxu1 %v480_v13  ;;  %p536_p11 = scmp.ne.s32.totalorder %s718_s14, %s535_s28  ;;  %p542_p0 = scmp.lt.s32.totalorder %s718_s14, %s540_s30 }
  0x1c   : > { %p543_p1 = scmp.lt.s32.totalorder %s541_s5, %s535_s28 }
  0x1d   : > { %p537_p12 = pnand %p536_p11, %p665_p5 }
  0x1e   : > { %483 = vmatpush3.bf16.msra.mxu0 %v480_v13  ;;  %492 = vmatpush3.bf16.msra.mxu1 %v480_v13  ;;  %p544_p2 = por %p543_p1, %p542_p0 }
  0x1f   : > { %460 = vmatprep.subr.mxu0 %v211_v14  ;;  %488 = vmatprep.subr.mxu1 %v211_v14  ;;  %p538_p13 = pneg %p537_p12 }
  0x21   : > { %p545_p3 = pnand %p544_p2, %p538_p13 }
  0x22   : > { %461 = vmatpush3.msra.mxu0 %v211_v14  ;;  %493 = vmatpush3.msra.mxu1 %v211_v14 }
  0x23   : > { %463 = vmatmul.mubr.msk.f32.vlgmr.msra.gmra.mrb[0].mxu0 %vm212_vm0, %v200_v15  ;;  %466 = vmatmul.mubr.msk.f32.vlgmr.msra.gmra.mrb[0].mxu1 %vm212_vm0, %v202_v16 }
  0xf6   : > { %v464_v18 = vpop.f32.mrb[0].mxu0  ;;  %v467_v20 = vpop.f32.mrb[0].mxu1 }
  0xf7   : > { %v318_v21 = vmul.f32 %v464_v18, %v423_v17  ;;  %v320_v22 = vmul.f32 %v467_v20, %v423_v17  ;;  %v291_v23 = vpop.f32.mrb[1].mxu0  ;;  %v301_v24 = vpop.f32.mrb[1].mxu1 }
  0xf8   : > { %v317_v25 = vmul.f32 %v423_v17, %v291_v23  ;;  %v319_v26 = vmul.f32 %v423_v17, %v301_v24 }
  0xf9   : > { %v329_v27 = vadd.f32 %v424_v19, %v318_v21  ;;  %v331_v28 = vadd.f32 %v424_v19, %v320_v22 }
  0xfa   : > { %v328_v29 = vadd.f32 %v424_v19, %v317_v25  ;;  %v330_v30 = vadd.f32 %v424_v19, %v319_v26 }
  0xfb   : > { %333 = vst [vmem:[%s191_s13 + $0x8] sm:$0xff] %v329_v27  ;;  %335 = vst [vmem:[%s191_s13 + $0x18] sm:$0xff] %v331_v28 }
  0xfc   : > { %332 = vst [vmem:[%s191_s13] sm:$0xff] %v328_v29  ;;  %334 = vst [vmem:[%s191_s13 + $0x10] sm:$0xff] %v330_v30 }
  0xfd   : > { %548 = shalt.err (!%p545_p3)
}
  0xfe   : > { %s549_s6 = scalar_lea.hbm %s723_s27, 512  ;;  %s553_s9 = scalar_lea.hbm %s770_s4, 2048 }
  0xff   : > { %p550_p4 = scmp.ne.s32.totalorder %s723_s27, %s549_s6  ;;  %p554_p9 = scmp.lt.u32.totalorder %s723_s27, %s770_s4 }
 0x100   : > { %p555_p10 = scmp.lt.u32.totalorder %s553_s9, %s549_s6  ;;  %p557_p12 = scmp.lt.u32.totalorder %s549_s6, %s723_s27 }
 0x101   : > { %p551_p7 = pnand %p550_p4, %p665_p5 }
 0x102   : > { %p556_p11 = por %p555_p10, %p554_p9 }
 0x103   : > { %p552_p8 = pneg %p551_p7 }
 0x104   : > { %p558_p13 = por %p557_p12, %p556_p11 }
 0x106   : > { %p559_p0 = pnand %p558_p13, %p552_p8 }
 0x108   : > { %562 = shalt.err (!%p559_p0)
}
 0x109   : > { %s600_s12 = smov 128   ;;  %s601_s13 = smov 8  }
 0x10a   : > { %494 = dma.vmem_to_hbm [thread:$0]  (%p665_p5), %s718_s14, 512, %s723_s27, %s725_s19, %s600_s12, %s600_s12, %s601_s13  }
 0x10b PF: > { %p500_p1 = scmp.ge.s32.totalorder %s597_s18, 2  ;;  %s365_s20 = sand.u32 1, %s585_s15  }
 0x10c   : > { %s366_s22 = scalar_lea.sflag [#allocation3], %s365_s20 }
 0x10d   : > { %p497_p2 = pnand %p500_p1, %p669_p6 }
 0x10f   : > { %580 = dma.done.wait (!%p497_p2), %s366_s22, 512  }
 0x110   : > { %582 = vsyncadd (!%p497_p2), %s366_s22, 4294966784  ;;  %p14_p3 = scmp.ge.s32.totalorder %s652_s21, 6   ;;  %s773_s15 = smov %s589_s16 }
 0x111   : > { %s774_s16 = smov %s593_s17  ;;  %s775_s17 = smov %s663_s24 }
 0x112   : > { %s776_s18 = smov %s652_s21  ;;  %16 = sbr.rel (!%p14_p3) target bundleno = 3 (0x3), region = 71 }
 0x119   :  { %371 = vsyncpa [#allocation3], 1 }
 0x11a   :  { %373 = vsyncpa [#allocation3 + $0x1], 1 }

</bundles_post_ra>
